<compile_context>
chip_gen: v7x
topology: tpu7x:2x2x1
jax: 0.10.0
libtpu: 0.0.40
codegen_flags: <defaults>
</compile_context>

<pallas_src>
import functools

import jax
import jax.numpy as jnp
from jax import lax
from jax.experimental import pallas as pl
from jax.experimental.pallas import tpu as pltpu


def _round_up(a, b):
    return -(-a // b) * b


def _pick_tm(m, tm_max):
    """Pick a token tile size: full (rounded to 8) if small, else the largest
    power-of-two tile <= tm_max that divides the 8-rounded token count."""
    m8 = _round_up(m, 8)
    if m8 <= tm_max:
        return m8
    t = tm_max
    while t >= 256:
        if m8 % t == 0:
            return t
        t //= 2
    return tm_max


def _vq_kernel(x_ref, cbsq_ref, cb_ref, q_ref, sse_ref, *, distance_dtype):
    """One tile of tokens: nearest-codebook lookup + per-tile squared error.

    x_ref   : (TM, D)       token tile (VMEM)
    cbsq_ref: (1,  Kp)      precomputed ||e||^2 (padded cols = +1e30 sentinel)
    cb_ref  : (Kp, D)       padded codebook (VMEM, resident)
    q_ref   : (TM, D)       quantized output tile
    sse_ref : (1, 8, 128)   per-tile SSE partial (scalar broadcast, lane-dense)
    """
    x = x_ref[...].astype(jnp.float32)        # (TM, D)
    cb = cb_ref[...].astype(jnp.float32)      # (Kp, D)

    # Squared-distance argmin is invariant to the per-row constant ||x||^2, so
    # only ||e||^2 - 2 x.e is needed.  ||e||^2 comes precomputed from the
    # wrapper; padded codebook columns carry +1e30 so they never win.
    xd = x.astype(distance_dtype)
    cbd = cb.astype(distance_dtype)
    dots = lax.dot_general(xd, cbd, (((1,), (1,)), ((), ())),
                           preferred_element_type=jnp.float32)   # (TM, Kp) MXU
    d2 = cbsq_ref[...] - 2.0 * dots                               # (TM, Kp)

    # Nearest codebook entry (first min on ties, matching torch.argmin).
    idx = jnp.argmin(d2, axis=1)                                  # (TM,)

    # Gather via one-hot matmul (MXU-friendly, avoids dynamic gather); padded
    # rows of cb are never selected so q is an exact codebook row.
    one_hot = (lax.broadcasted_iota(jnp.int32, d2.shape, 1)
               == idx[:, None]).astype(jnp.float32)               # (TM, Kp)
    q = jnp.dot(one_hot, cb, preferred_element_type=jnp.float32)  # (TM, D)

    q_ref[...] = q.astype(q_ref.dtype)

    # Per-tile partial sum of squared error (reduced fully in the wrapper).
    diff = q - x
    tile_sse = jnp.sum(diff * diff)
    sse_ref[...] = jnp.full(sse_ref.shape, tile_sse, dtype=jnp.float32)


def quantizer_forward(x_nchw, codebook, comm_cost, beta=0.25, *,
                      tm_max=4096, use_bf16_distances=False):
    """Forward pass of the VQ-VAE Quantizer.

    x_nchw   : (N, C, H, W) with C == emb_dim
    codebook : (num_emb, emb_dim)
    Returns (c_loss, quantized_nchw) matching the PyTorch forward values
    (straight-through estimator / .detach() only affect gradients).
    """
    n, c, h, w = x_nchw.shape
    k, d = codebook.shape
    assert c == d, "channel dim must equal emb_dim"

    # NCHW -> NHWC -> (M, D)
    x_flat = jnp.transpose(x_nchw, (0, 2, 3, 1)).reshape(-1, d).astype(jnp.float32)
    m = x_flat.shape[0]

    # Pad codebook to a lane-dense Kp (multiple of 128).  Padded rows are zero
    # vectors whose squared-norm entry is a huge sentinel so argmin never
    # selects them.
    kp = _round_up(k, 128)
    cb_f32 = codebook.astype(jnp.float32)
    cb_sq = jnp.sum(cb_f32 * cb_f32, axis=1)                      # (K,)
    if kp > k:
        cb_padded = jnp.concatenate(
            [cb_f32, jnp.zeros((kp - k, d), jnp.float32)], axis=0)
        cb_sq = jnp.concatenate(
            [cb_sq, jnp.full((kp - k,), 1e30, jnp.float32)], axis=0)
    else:
        cb_padded = cb_f32
    cb_sq_row = cb_sq.reshape(1, kp)

    # Token tiling: large tiles to amortize per-grid-step overhead; padded rows
    # (copies of row 0) are corrected out of the SSE afterwards.
    tm = _pick_tm(m, tm_max)
    pad = (-m) % tm
    if pad:
        x_padded = jnp.concatenate(
            [x_flat, jnp.broadcast_to(x_flat[:1], (pad, d))], axis=0)
    else:
        x_padded = x_flat
    m_pad = x_padded.shape[0]
    num_tiles = m_pad // tm

    kernel = functools.partial(
        _vq_kernel,
        distance_dtype=jnp.bfloat16 if use_bf16_distances else jnp.float32)

    q_flat, sse_parts = pl.pallas_call(
        kernel,
        out_shape=(
            jax.ShapeDtypeStruct((m_pad, d), jnp.float32),
            jax.ShapeDtypeStruct((num_tiles, 8, 128), jnp.float32),
        ),
        grid_spec=pltpu.PrefetchScalarGridSpec(
            num_scalar_prefetch=0,
            grid=(num_tiles,),
            in_specs=[
                pl.BlockSpec((tm, d), lambda i: (i, 0)),     # token tile
                pl.BlockSpec((1, kp), lambda i: (0, 0)),     # ||e||^2 row, resident
                pl.BlockSpec((kp, d), lambda i: (0, 0)),     # codebook, resident
            ],
            out_specs=(
                pl.BlockSpec((tm, d), lambda i: (i, 0)),         # quantized tile
                pl.BlockSpec((1, 8, 128), lambda i: (i, 0, 0)),  # per-tile SSE
            ),
        ),
        compiler_params=pltpu.CompilerParams(
            dimension_semantics=("parallel",)),   # grid steps are independent
    )(x_padded, cb_sq_row, cb_padded)

    q_flat = q_flat[:m]

    # Reduce per-tile SSE partials; correct for padded (duplicated row 0) rows.
    sse_total = jnp.sum(sse_parts[:, 0, 0])
    if pad:
        row0_err = jnp.sum((q_flat[0] - x_flat[0]) ** 2)
        sse_total = sse_total - pad * row0_err

    mse = sse_total / (m * d)
    # e_latent_loss = mse * beta ; q_latent_loss = mse (forward values identical)
    c_loss = mse + comm_cost * (beta * mse)

    # Straight-through forward value == quantized values; (M, D) -> NHWC -> NCHW.
    quantized = q_flat.reshape(n, h, w, c).transpose(0, 3, 1, 2)
    return c_loss, quantized


def _reference(x_nchw, codebook, comm_cost, beta=0.25):
    """Pure-JAX reference mirroring the PyTorch forward."""
    n, c, h, w = x_nchw.shape
    x = jnp.transpose(x_nchw, (0, 2, 3, 1))
    flat = x.reshape(-1, c)
    # argmin over the codebook of the L2 distance == argmin of
    # ||e||^2 - 2 x.e  (the per-row constant ||x||^2 cannot change the argmin),
    # which matches torch.cdist(...).argmin(dim=1).
    d2 = jnp.sum(codebook ** 2, axis=1)[None, :] - 2.0 * flat @ codebook.T
    idx = jnp.argmin(d2, axis=1)
    q = codebook[idx].reshape(x.shape)
    mse = jnp.mean((q - x) ** 2)
    c_loss = mse + comm_cost * (beta * mse)
    return c_loss, jnp.transpose(q, (0, 3, 1, 2))


if __name__ == "__main__":
    # Small shapes consistent with the module: C (=emb_dim) = 32, K = 64.
    num_emb, emb_dim = 64, 32
    comm_cost, beta = 0.25, 0.25
    N, H, W = 2, 8, 8

    key = jax.random.PRNGKey(0)
    k_x, k_e = jax.random.split(key)
    x = jax.random.normal(k_x, (N, emb_dim, H, W), dtype=jnp.float32)
    # nn.Embedding weight init: uniform(-1/num_emb, 1/num_emb)
    codebook = jax.random.uniform(
        k_e, (num_emb, emb_dim), minval=-1.0 / num_emb, maxval=1.0 / num_emb,
        dtype=jnp.float32)

    c_loss, quantized = quantizer_forward(x, codebook, comm_cost, beta)
    jax.block_until_ready((c_loss, quantized))

    ref_loss, ref_q = _reference(x, codebook, comm_cost, beta)
    assert quantized.shape == (N, emb_dim, H, W)
    assert jnp.allclose(quantized, ref_q, atol=1e-5), "quantized mismatch"
    assert jnp.allclose(c_loss, ref_loss, rtol=1e-5, atol=1e-6), "loss mismatch"

    print("KERNEL_OK")
</pallas_src>

<mosaic_0001>
module attributes {stable_mosaic.version = 11 : i64} {
  func.func @_vq_kernel(%arg0: i32, %arg1: memref<128x32xf32, #tpu.memory_space<vmem>>, %arg2: memref<1x128xf32, #tpu.memory_space<vmem>>, %arg3: memref<128x32xf32, #tpu.memory_space<vmem>>, %arg4: memref<128x32xf32, #tpu.memory_space<vmem>>, %arg5: memref<1x8x128xf32, #tpu.memory_space<vmem>>) attributes {dimension_semantics = [#tpu.dimension_semantics<parallel>], iteration_bounds = array<i64: 1>, scalar_prefetch = 0 : i64, scratch_operands = 0 : i64, tpu.core_type = #tpu.core_type<tc>, window_params = [{transform_indices = @transform_0, window_bounds = array<i64: 128, 32>}, {pipeline_mode = #tpu.pipeline_mode<synchronous>, transform_indices = @transform_1, window_bounds = array<i64: 1, 128>}, {pipeline_mode = #tpu.pipeline_mode<synchronous>, transform_indices = @transform_2, window_bounds = array<i64: 128, 32>}, {transform_indices = @transform_3, window_bounds = array<i64: 128, 32>}, {transform_indices = @transform_4, window_bounds = array<i64: 1, 8, 128>}]} {
    %c0 = arith.constant 0 : index
    %c0_0 = arith.constant 0 : index
    %0 = vector.load %arg1[%c0, %c0_0] : memref<128x32xf32, #tpu.memory_space<vmem>>, vector<128x32xf32>
    %c0_1 = arith.constant 0 : index
    %c0_2 = arith.constant 0 : index
    %1 = vector.load %arg3[%c0_1, %c0_2] : memref<128x32xf32, #tpu.memory_space<vmem>>, vector<128x32xf32>
    %cst = arith.constant dense<0.000000e+00> : vector<128x128xf32>
    %2 = tpu.matmul %0, %1, %cst {dimension_numbers = #tpu.dot_dimension_numbers<[1], [1], [0], [0], [0, 0, 1, 0], [], []>} : vector<128x32xf32>, vector<128x32xf32>, vector<128x128xf32> -> vector<128x128xf32>
    %c0_3 = arith.constant 0 : index
    %c0_4 = arith.constant 0 : index
    %3 = vector.load %arg2[%c0_3, %c0_4] : memref<1x128xf32, #tpu.memory_space<vmem>>, vector<1x128xf32>
    %cst_5 = arith.constant 2.000000e+00 : f32
    %4 = vector.broadcast %cst_5 : f32 to vector<128x128xf32>
    %5 = arith.mulf %4, %2 : vector<128x128xf32>
    %6 = vector.broadcast %3 : vector<1x128xf32> to vector<128x128xf32>
    %7 = arith.subf %6, %5 : vector<128x128xf32>
    %8 = tpu.reduce_index %7 {axis = 1 : i32, kind = #tpu.reduction_kind<arg_min>} : vector<128x128xf32> -> vector<128xi32>
    %9 = tpu.iota {dimensions = array<i32: 1>} : vector<128x128xi32>
    %10 = vector.shape_cast %8 : vector<128xi32> to vector<128x1xi32>
    %11 = vector.broadcast %10 : vector<128x1xi32> to vector<128x128xi32>
    %12 = arith.cmpi eq, %9, %11 : vector<128x128xi32>
    %13 = arith.extui %12 : vector<128x128xi1> to vector<128x128xi32>
    %14 = arith.sitofp %13 : vector<128x128xi32> to vector<128x128xf32>
    %cst_6 = arith.constant dense<0.000000e+00> : vector<128x32xf32>
    %15 = tpu.matmul %14, %1, %cst_6 {dimension_numbers = #tpu.dot_dimension_numbers<[1], [0], [0], [1], [0, 0, 1, 1], [], []>} : vector<128x128xf32>, vector<128x32xf32>, vector<128x32xf32> -> vector<128x32xf32>
    %c0_7 = arith.constant 0 : index
    %c0_8 = arith.constant 0 : index
    %16 = vector.load %arg4[%c0_7, %c0_8] : memref<128x32xf32, #tpu.memory_space<vmem>>, vector<128x32xf32>
    tpu.vector_store %arg4[%c0_7, %c0_8], %15 {strides = array<i32>} : memref<128x32xf32, #tpu.memory_space<vmem>>, vector<128x32xf32>,
    %17 = arith.subf %15, %0 : vector<128x32xf32>
    %18 = arith.mulf %17, %17 : vector<128x32xf32>
    %19 = vector.shape_cast %18 : vector<128x32xf32> to vector<1x128x32xf32>
    %cst_9 = arith.constant dense<0.000000e+00> : vector<1xf32>
    %20 = vector.multi_reduction <add>, %19, %cst_9 [1, 2] : vector<1x128x32xf32> to vector<1xf32>
    %21 = vector.shape_cast %20 : vector<1xf32> to vector<1x1x1xf32>
    %22 = vector.extract %21[0, 0, 0] : f32 from vector<1x1x1xf32>
    %23 = vector.broadcast %22 : f32 to vector<1x8x128xf32>
    %c0_10 = arith.constant 0 : index
    %c0_11 = arith.constant 0 : index
    %c0_12 = arith.constant 0 : index
    %24 = vector.load %arg5[%c0_10, %c0_11, %c0_12] : memref<1x8x128xf32, #tpu.memory_space<vmem>>, vector<1x8x128xf32>
    tpu.vector_store %arg5[%c0_10, %c0_11, %c0_12], %23 {strides = array<i32>} : memref<1x8x128xf32, #tpu.memory_space<vmem>>, vector<1x8x128xf32>,
    return
  }
  func.func @transform_0(%arg0: i32) -> (i32, i32) {
    %c0_i32 = arith.constant 0 : i32
    %c0_i32_0 = arith.constant 0 : i32
    return %arg0, %c0_i32 : i32, i32
  }
  func.func @transform_1(%arg0: i32) -> (i32, i32) {
    %c0_i32 = arith.constant 0 : i32
    %c0_i32_0 = arith.constant 0 : i32
    %c0_i32_1 = arith.constant 0 : i32
    return %c0_i32, %c0_i32_0 : i32, i32
  }
  func.func @transform_2(%arg0: i32) -> (i32, i32) {
    %c0_i32 = arith.constant 0 : i32
    %c0_i32_0 = arith.constant 0 : i32
    %c0_i32_1 = arith.constant 0 : i32
    return %c0_i32, %c0_i32_0 : i32, i32
  }
  func.func @transform_3(%arg0: i32) -> (i32, i32) {
    %c0_i32 = arith.constant 0 : i32
    %c0_i32_0 = arith.constant 0 : i32
    return %arg0, %c0_i32 : i32, i32
  }
  func.func @transform_4(%arg0: i32) -> (i32, i32, i32) {
    %c0_i32 = arith.constant 0 : i32
    %c0_i32_0 = arith.constant 0 : i32
    %c0_i32_1 = arith.constant 0 : i32
    return %arg0, %c0_i32, %c0_i32_0 : i32, i32, i32
  }
}

</mosaic_0001>

<bundles_post_ra>
// kernel: tpu_custom_call.1
= control target key start
LH: loop header
LB: loop body
LE: loop exit
PB: predicated region body
PF: predicated region fallthrough
CT: control target
= control target key end

     0   :  { %vm49_vm0 = vcmask 261120   ;;  %s1350_s0 = inlined_call_operand.vmem [shape: f32[128,32], index: 0, kind: input, shape index: {}]   ;;  %s1351_s1 = inlined_call_operand.vmem [shape: f32[1,128], index: 1, kind: input, shape index: {}]   ;;  %s1352_s2 = inlined_call_operand.vmem [shape: f32[128,32], index: 2, kind: input, shape index: {}]   ;;  %s1353_s3 = inlined_call_operand.vmem [shape: f32[128,32], index: 3, kind: output, shape index: {0}]   ;;  %s1354_s4 = inlined_call_operand.hbm [shape: f32[1,8,128], index: 4, kind: output, shape index: {1}]  }
   0x1   :  { %v33_v0 = vld [vmem:[%s1352_s2] sm:$0xff]  ;;  %v34_v1 = vld [vmem:[%s1352_s2 + $0x8] sm:$0xff]  ;;  %v35_v2 = vld [vmem:[%s1352_s2 + $0x10] sm:$0xff] }
   0x2   :  { %v906_v3 = vpack.c.bf16 %v34_v1, %v33_v0  ;;  %vm1052_vm1 = vmpackc.low %vm49_vm0, %vm49_vm0  ;;  %v36_v5 = vld [vmem:[%s1352_s2 + $0x18] sm:$0xff]  ;;  %v37_v7 = vld [vmem:[%s1352_s2 + $0x20] sm:$0xff] }
   0x3   :  { %v912_v6 = vpack.c.bf16 %v36_v5, %v35_v2  ;;  %v38_v8 = vld [vmem:[%s1352_s2 + $0x28] sm:$0xff]  ;;  %v1074_v9 = vld [vmem:[%s1350_s0] sm:$0xff]  ;;  %v39_v11 = vld [vmem:[%s1352_s2 + $0x30] sm:$0xff] }
   0x4   :  { %908 = vmatprep.subr.msk.bf16.mxu0 %vm1052_vm1, %v906_v3  ;;  %955 = vmatprep.subr.bf16.mxu1 %v906_v3  ;;  %v918_v10 = vpack.c.bf16 %v38_v8, %v37_v7  ;;  %v40_v12 = vld [vmem:[%s1352_s2 + $0x38] sm:$0xff] }
   0x5   :  { %911 = vmatpush3.bf16.xpose.msk.msra.mxu0 %vm1052_vm1, %v906_v3  ;;  %957 = vmatpush3.bf16.msra.mxu1 %v906_v3  ;;  %v924_v13 = vpack.c.bf16 %v40_v12, %v39_v11 }
   0x6   :  { %914 = vmatprep.subr.msk.bf16.mxu0 %vm1052_vm1, %v912_v6  ;;  %959 = vmatprep.subr.bf16.mxu1 %v912_v6 }
   0x7   :  { %826 = vmatprep.mubr.msk.f32.mxu0 %vm49_vm0, %v1074_v9 }
   0x9   :  { %961 = vmatpush3.bf16.msra.mxu1 %v912_v6 }
   0xa   :  { %963 = vmatprep.subr.bf16.mxu1 %v918_v10 }
   0xb   :  { %10 = vsyncpa [#allocation3], 0  ;;  %v41_v14 = vld [vmem:[%s1352_s2 + $0x40] sm:$0xff]  ;;  %v42_v15 = vld [vmem:[%s1352_s2 + $0x48] sm:$0xff] }
   0xc   :  { %v930_v16 = vpack.c.bf16 %v42_v15, %v41_v14  ;;  %v43_v17 = vld [vmem:[%s1352_s2 + $0x50] sm:$0xff]  ;;  %v44_v18 = vld [vmem:[%s1352_s2 + $0x58] sm:$0xff]  ;;  %v45_v20 = vld [vmem:[%s1352_s2 + $0x60] sm:$0xff] }
   0xd   :  { %917 = vmatpush3.bf16.xpose.msk.msra.mxu0 %vm1052_vm1, %v912_v6  ;;  %965 = vmatpush3.bf16.msra.mxu1 %v918_v10  ;;  %v936_v19 = vpack.c.bf16 %v44_v18, %v43_v17  ;;  %v46_v21 = vld [vmem:[%s1352_s2 + $0x68] sm:$0xff]  ;;  %v47_v23 = vld [vmem:[%s1352_s2 + $0x70] sm:$0xff]  ;;  %v48_v24 = vld [vmem:[%s1352_s2 + $0x78] sm:$0xff] }
   0xe   :  { %920 = vmatprep.subr.msk.bf16.mxu0 %vm1052_vm1, %v918_v10  ;;  %967 = vmatprep.subr.bf16.mxu1 %v924_v13  ;;  %v942_v22 = vpack.c.bf16 %v46_v21, %v45_v20  ;;  %v948_v25 = vpack.c.bf16 %v48_v24, %v47_v23  ;;  %v1137_v26 = vld [vmem:[%s1350_s0 + $0x8] sm:$0xff]  ;;  %v1142_v27 = vld [vmem:[%s1350_s0 + $0x10] sm:$0xff]  ;;  %v1151_v28 = vld [vmem:[%s1350_s0 + $0x18] sm:$0xff] }
   0xf   :  { %v1156_v29 = vld [vmem:[%s1350_s0 + $0x20] sm:$0xff]  ;;  %v1165_v30 = vld [vmem:[%s1350_s0 + $0x28] sm:$0xff]  ;;  %v1170_v31 = vld [vmem:[%s1350_s0 + $0x30] sm:$0xff] }
  0x10   :  { %v1179_v32 = vld [vmem:[%s1350_s0 + $0x38] sm:$0xff]  ;;  %v1184_v33 = vld [vmem:[%s1350_s0 + $0x40] sm:$0xff]  ;;  %v1193_v34 = vld [vmem:[%s1350_s0 + $0x48] sm:$0xff] }
  0x11   :  { %969 = vmatpush3.bf16.msra.mxu1 %v924_v13  ;;  %v1198_v35 = vld [vmem:[%s1350_s0 + $0x50] sm:$0xff]  ;;  %v1207_v36 = vld [vmem:[%s1350_s0 + $0x58] sm:$0xff]  ;;  %v1212_v37 = vld [vmem:[%s1350_s0 + $0x60] sm:$0xff] }
  0x12   :  { %971 = vmatprep.subr.bf16.mxu1 %v930_v16  ;;  %v1221_v38 = vld [vmem:[%s1350_s0 + $0x68] sm:$0xff]  ;;  %v1226_v39 = vld [vmem:[%s1350_s0 + $0x70] sm:$0xff]  ;;  %v1235_v40 = vld [vmem:[%s1350_s0 + $0x78] sm:$0xff] }
  0x13   :  { %v697_v43 = vld [vmem:[%s1351_s1] ss:$0 sm:$0xff] }
  0x15   :  { %923 = vmatpush3.bf16.xpose.msk.msra.mxu0 %vm1052_vm1, %v918_v10  ;;  %973 = vmatpush3.bf16.msra.mxu1 %v930_v16 }
  0x16   :  { %926 = vmatprep.subr.msk.bf16.mxu0 %vm1052_vm1, %v924_v13  ;;  %975 = vmatprep.subr.bf16.mxu1 %v936_v19 }
  0x19   :  { %977 = vmatpush3.bf16.msra.mxu1 %v936_v19 }
  0x1a   :  { %979 = vmatprep.subr.bf16.mxu1 %v942_v22 }
  0x1d   :  { %929 = vmatpush3.bf16.xpose.msk.msra.mxu0 %vm1052_vm1, %v924_v13  ;;  %981 = vmatpush3.bf16.msra.mxu1 %v942_v22 }
  0x1e   :  { %932 = vmatprep.subr.msk.bf16.mxu0 %vm1052_vm1, %v930_v16  ;;  %983 = vmatprep.subr.bf16.mxu1 %v948_v25 }
  0x21   :  { %985 = vmatpush3.bf16.msra.mxu1 %v948_v25 }
  0x25   :  { %935 = vmatpush3.bf16.xpose.msk.msra.mxu0 %vm1052_vm1, %v930_v16 }
  0x26   :  { %938 = vmatprep.subr.msk.bf16.mxu0 %vm1052_vm1, %v936_v19 }
  0x2d   :  { %941 = vmatpush3.bf16.xpose.msk.msra.mxu0 %vm1052_vm1, %v936_v19 }
  0x2e   :  { %944 = vmatprep.subr.msk.bf16.mxu0 %vm1052_vm1, %v942_v22 }
  0x35   :  { %947 = vmatpush3.bf16.xpose.msk.msra.mxu0 %vm1052_vm1, %v942_v22 }
  0x36   :  { %950 = vmatprep.subr.msk.bf16.mxu0 %vm1052_vm1, %v948_v25 }
  0x3d   :  { %953 = vmatpush3.bf16.xpose.msk.msra.mxu0 %vm1052_vm1, %v948_v25 }
  0x44   :  { %827 = vmatmul.mubr.msk.f32.vlgmr.msra.gmra.mrb[0].mxu0 %vm49_vm0, %v1137_v26 }
  0x45   :  { %829 = vmatprep.mubr.msk.f32.mxu0 %vm49_vm0, %v1142_v27 }
  0x48   :  { %830 = vmatmul.mubr.msk.f32.gmra.mrb[2].mxu0 %vm49_vm0, %v1151_v28 }
  0x49   :  { %832 = vmatprep.mubr.msk.f32.mxu0 %vm49_vm0, %v1156_v29 }
  0x4c   :  { %833 = vmatmul.mubr.msk.f32.gmra.mrb[4].mxu0 %vm49_vm0, %v1165_v30 }
  0x4d   :  { %835 = vmatprep.mubr.msk.f32.mxu0 %vm49_vm0, %v1170_v31 }
  0x50   :  { %836 = vmatmul.mubr.msk.f32.gmra.mrb[6].mxu0 %vm49_vm0, %v1179_v32 }
  0x51   :  { %838 = vmatprep.mubr.msk.f32.mxu0 %vm49_vm0, %v1184_v33 }
  0x54   :  { %839 = vmatmul.mubr.msk.f32.gmra.mrb[8].mxu0 %vm49_vm0, %v1193_v34 }
  0x55   :  { %841 = vmatprep.mubr.msk.f32.mxu0 %vm49_vm0, %v1198_v35 }
  0x58   :  { %842 = vmatmul.mubr.msk.f32.gmra.mrb[10].mxu0 %vm49_vm0, %v1207_v36 }
  0x59   :  { %844 = vmatprep.mubr.msk.f32.mxu0 %vm49_vm0, %v1212_v37 }
  0x5c   :  { %845 = vmatmul.mubr.msk.f32.gmra.mrb[12].mxu0 %vm49_vm0, %v1221_v38 }
  0x5d   :  { %847 = vmatprep.mubr.msk.f32.mxu0 %vm49_vm0, %v1226_v39 }
  0x60   :  { %848 = vmatmul.mubr.msk.f32.gmra.mrb[14].mxu0 %vm49_vm0, %v1235_v40 }
 0x117   :  { %v828_v41 = vpop.f32.mrb[0].mxu0 }
 0x118   :  { %v212_v42 = vpop.f32.mrb[1].mxu0  ;;  %v293_v45 = vmul.f32 2.0, %v828_v41 }
 0x119   :  { %v292_v44 = vmul.f32 2.0, %v212_v42  ;;  %v362_v42 = vlaneseq }
 0x11a   :  { %v315_v51 = vsub.f32 %v697_v43, %v293_v45 }
 0x11b   :  { %v831_v46 = vpop.f32.mrb[2].mxu0  ;;  %v314_v47 = vsub.f32 %v697_v43, %v292_v44  ;;  %v363_v44 = vand.u32 127, %v362_v42 }
 0x11c   :  { %v222_v48 = vpop.f32.mrb[3].mxu0  ;;  %v295_v50 = vmul.f32 2.0, %v831_v46  ;;  %v1014_v46 = vmov 1.0  }
 0x11d   :  { %v294_v49 = vmul.f32 2.0, %v222_v48  ;;  %330 = vmin.index.xlane.f32.xlu0 %v314_v47 }
 0x11e   :  { %v317_v57 = vsub.f32 %v697_v43, %v295_v50 }
 0x11f   :  { %v316_v52 = vsub.f32 %v697_v43, %v294_v49  ;;  %v834_v53 = vpop.f32.mrb[4].mxu0 }
 0x120   :  { %v232_v54 = vpop.f32.mrb[5].mxu0  ;;  %v297_v56 = vmul.f32 2.0, %v834_v53 }
 0x121   :  { %332 = vmin.index.xlane.f32.xlu0 %v315_v51  ;;  %334 = vmin.index.xlane.f32.xlu1 %v316_v52  ;;  %v296_v55 = vmul.f32 2.0, %v232_v54 }
 0x122   :  { %v319_v63 = vsub.f32 %v697_v43, %v297_v56 }
 0x123   :  { %v837_v58 = vpop.f32.mrb[6].mxu0  ;;  %v318_v59 = vsub.f32 %v697_v43, %v296_v55 }
 0x124   :  { %v242_v60 = vpop.f32.mrb[7].mxu0  ;;  %v299_v62 = vmul.f32 2.0, %v837_v58 }
 0x125   :  { %336 = vmin.index.xlane.f32.xlu1 %v317_v57  ;;  %v298_v61 = vmul.f32 2.0, %v242_v60  ;;  %338 = vmin.index.xlane.f32.xlu0 %v318_v59 }
 0x126   :  { %v321_v5 = vsub.f32 %v697_v43, %v299_v62 }
 0x127   :  { %v840_v0 = vpop.f32.mrb[8].mxu0  ;;  %v320_v1 = vsub.f32 %v697_v43, %v298_v61 }
 0x128   :  { %v252_v2 = vpop.f32.mrb[9].mxu0  ;;  %v301_v4 = vmul.f32 2.0, %v840_v0 }
 0x129   :  { %340 = vmin.index.xlane.f32.xlu1 %v319_v63  ;;  %v300_v3 = vmul.f32 2.0, %v252_v2  ;;  %342 = vmin.index.xlane.f32.xlu0 %v320_v1 }
 0x12a   :  { %v323_v12 = vsub.f32 %v697_v43, %v301_v4 }
 0x12b   :  { %v843_v6 = vpop.f32.mrb[10].mxu0  ;;  %v322_v7 = vsub.f32 %v697_v43, %v300_v3 }
 0x12c   :  { %v262_v8 = vpop.f32.mrb[11].mxu0  ;;  %v303_v11 = vmul.f32 2.0, %v843_v6 }
 0x12d   :  { %344 = vmin.index.xlane.f32.xlu1 %v321_v5  ;;  %v302_v10 = vmul.f32 2.0, %v262_v8  ;;  %346 = vmin.index.xlane.f32.xlu0 %v322_v7 }
 0x12e   :  { %v325_v18 = vsub.f32 %v697_v43, %v303_v11 }
 0x12f   :  { %v846_v13 = vpop.f32.mrb[12].mxu0  ;;  %v324_v14 = vsub.f32 %v697_v43, %v302_v10 }
 0x130   :  { %v272_v15 = vpop.f32.mrb[13].mxu0  ;;  %v305_v17 = vmul.f32 2.0, %v846_v13 }
 0x131   :  { %348 = vmin.index.xlane.f32.xlu1 %v323_v12  ;;  %v304_v16 = vmul.f32 2.0, %v272_v15  ;;  %350 = vmin.index.xlane.f32.xlu0 %v324_v14 }
 0x132   :  { %v327_v24 = vsub.f32 %v697_v43, %v305_v17 }
 0x133   :  { %v849_v19 = vpop.f32.mrb[14].mxu0  ;;  %v326_v20 = vsub.f32 %v697_v43, %v304_v16 }
 0x134   :  { %v282_v21 = vpop.f32.mrb[15].mxu0  ;;  %v307_v23 = vmul.f32 2.0, %v849_v19 }
 0x135   :  { %352 = vmin.index.xlane.f32.xlu1 %v325_v18  ;;  %v306_v22 = vmul.f32 2.0, %v282_v21  ;;  %354 = vmin.index.xlane.f32.xlu0 %v326_v20 }
 0x136   :  { %v329_v41 = vsub.f32 %v697_v43, %v307_v23 }
 0x137   :  { %v328_v25 = vsub.f32 %v697_v43, %v306_v22 }
 0x139   :  { %356 = vmin.index.xlane.f32.xlu1 %v327_v24  ;;  %358 = vmin.index.xlane.f32.xlu0 %v328_v25 }
 0x13d   :  { %360 = vmin.index.xlane.f32.xlu1 %v329_v41 }
 0x1aa   :  { %v331_v45 = vpop.xlane.xlu0 %330 }
 0x1ab   :  { %vm364_vm2 = vcmp.eq.s32.totalorder %v363_v44, %v331_v45 }
 0x1ac   :  { %882 = vmatprep.mubr.msk.f32.mxu1 %vm364_vm2, %v1014_v46 }
 0x1ae   :  { %v333_v47 = vpop.xlane.xlu0 %332  ;;  %v335_v48 = vpop.xlane.xlu1 %334 }
 0x1af   :  { %vm365_vm3 = vcmp.eq.s32.totalorder %v363_v44, %v333_v47  ;;  %vm366_vm4 = vcmp.eq.s32.totalorder %v363_v44, %v335_v48 }
 0x1b0   :  { %883 = vmatmul.mubr.msk.f32.vlgmr.msra.gmra.mrb[0].mxu1 %vm365_vm3, %v1014_v46 }
 0x1b1   :  { %885 = vmatprep.mubr.msk.f32.mxu1 %vm366_vm4, %v1014_v46 }
 0x1b2   :  { %v337_v49 = vpop.xlane.xlu1 %336  ;;  %v339_v50 = vpop.xlane.xlu0 %338 }
 0x1b3   :  { %vm367_vm5 = vcmp.eq.s32.totalorder %v363_v44, %v337_v49  ;;  %vm368_vm6 = vcmp.eq.s32.totalorder %v363_v44, %v339_v50 }
 0x1b4   :  { %886 = vmatmul.mubr.msk.f32.gmra.mrb[2].mxu1 %vm367_vm5, %v1014_v46 }
 0x1b5   :  { %888 = vmatprep.mubr.msk.f32.mxu1 %vm368_vm6, %v1014_v46 }
 0x1b6   :  { %v341_v43 = vpop.xlane.xlu1 %340  ;;  %v343_v51 = vpop.xlane.xlu0 %342 }
 0x1b7   :  { %vm369_vm7 = vcmp.eq.s32.totalorder %v363_v44, %v341_v43  ;;  %vm370_vm8 = vcmp.eq.s32.totalorder %v363_v44, %v343_v51 }
 0x1b8   :  { %889 = vmatmul.mubr.msk.f32.gmra.mrb[4].mxu1 %vm369_vm7, %v1014_v46 }
 0x1b9   :  { %891 = vmatprep.mubr.msk.f32.mxu1 %vm370_vm8, %v1014_v46 }
 0x1ba   :  { %v345_v52 = vpop.xlane.xlu1 %344  ;;  %v347_v53 = vpop.xlane.xlu0 %346 }
 0x1bb   :  { %vm371_vm9 = vcmp.eq.s32.totalorder %v363_v44, %v345_v52  ;;  %vm372_vm10 = vcmp.eq.s32.totalorder %v363_v44, %v347_v53 }
 0x1bc   :  { %892 = vmatmul.mubr.msk.f32.gmra.mrb[6].mxu1 %vm371_vm9, %v1014_v46 }
 0x1bd   :  { %894 = vmatprep.mubr.msk.f32.mxu1 %vm372_vm10, %v1014_v46 }
 0x1be   :  { %v349_v54 = vpop.xlane.xlu1 %348  ;;  %v351_v55 = vpop.xlane.xlu0 %350 }
 0x1bf   :  { %vm373_vm11 = vcmp.eq.s32.totalorder %v363_v44, %v349_v54  ;;  %vm374_vm12 = vcmp.eq.s32.totalorder %v363_v44, %v351_v55 }
 0x1c0   :  { %895 = vmatmul.mubr.msk.f32.gmra.mrb[8].mxu1 %vm373_vm11, %v1014_v46 }
 0x1c1   :  { %897 = vmatprep.mubr.msk.f32.mxu1 %vm374_vm12, %v1014_v46 }
 0x1c2   :  { %v353_v56 = vpop.xlane.xlu1 %352  ;;  %v355_v57 = vpop.xlane.xlu0 %354 }
 0x1c3   :  { %vm375_vm13 = vcmp.eq.s32.totalorder %v363_v44, %v353_v56  ;;  %vm376_vm14 = vcmp.eq.s32.totalorder %v363_v44, %v355_v57 }
 0x1c4   :  { %898 = vmatmul.mubr.msk.f32.gmra.mrb[10].mxu1 %vm375_vm13, %v1014_v46 }
 0x1c5   :  { %900 = vmatprep.mubr.msk.f32.mxu1 %vm376_vm14, %v1014_v46 }
 0x1c6   :  { %v357_v58 = vpop.xlane.xlu1 %356  ;;  %v359_v59 = vpop.xlane.xlu0 %358 }
 0x1c7   :  { %vm377_vm15 = vcmp.eq.s32.totalorder %v363_v44, %v357_v58  ;;  %vm378_vm1 = vcmp.eq.s32.totalorder %v363_v44, %v359_v59 }
 0x1c8   :  { %901 = vmatmul.mubr.msk.f32.gmra.mrb[12].mxu1 %vm377_vm15, %v1014_v46 }
 0x1c9   :  { %903 = vmatprep.mubr.msk.f32.mxu1 %vm378_vm1, %v1014_v46 }
 0x1ca   :  { %v361_v60 = vpop.xlane.xlu1 %360 }
 0x1cb   :  { %vm379_vm2 = vcmp.eq.s32.totalorder %v363_v44, %v361_v60 }
 0x1cc   :  { %904 = vmatmul.mubr.msk.f32.gmra.mrb[14].mxu1 %vm379_vm2, %v1014_v46 }
 0x283   :  { %v884_v61 = vpop.f32.mrb[0].mxu1 }
 0x284   :  { %558 = vst.msk [vmem:[%s1353_s3 + $0x8] sm:$0xff] %vm49_vm0, %v884_v61  ;;  %v574_v62 = vsub.f32 %v884_v61, %v1137_v26  ;;  %v478_v63 = vpop.f32.mrb[1].mxu1 }
 0x285   :  { %557 = vst.msk [vmem:[%s1353_s3] sm:$0xff] %vm49_vm0, %v478_v63  ;;  %v573_v0 = vsub.f32 %v478_v63, %v1074_v9 }
 0x286   :  { %v590_v1 = vmul.f32 %v574_v62, %v574_v62 }
 0x287   :  { %v589_v2 = vmul.f32 %v573_v0, %v573_v0  ;;  %v887_v3 = vpop.f32.mrb[2].mxu1 }
 0x288   :  { %v606_v4 = vsel %vm49_vm0, %v590_v1, 0.0  ;;  %560 = vst.msk [vmem:[%s1353_s3 + $0x18] sm:$0xff] %vm49_vm0, %v887_v3  ;;  %v576_v26 = vsub.f32 %v887_v3, %v1151_v28  ;;  %v488_v5 = vpop.f32.mrb[3].mxu1 }
 0x289   :  { %v605_v6 = vsel %vm49_vm0, %v589_v2, 0.0  ;;  %559 = vst.msk [vmem:[%s1353_s3 + $0x10] sm:$0xff] %vm49_vm0, %v488_v5  ;;  %v575_v9 = vsub.f32 %v488_v5, %v1142_v27 }
 0x28a   :  { %v607_v7 = vadd.f32 %v606_v4, %v605_v6  ;;  %v592_v8 = vmul.f32 %v576_v26, %v576_v26 }
 0x28b   :  { %v591_v10 = vmul.f32 %v575_v9, %v575_v9  ;;  %v890_v11 = vpop.f32.mrb[4].mxu1 }
 0x28c   :  { %562 = vst.msk [vmem:[%s1353_s3 + $0x28] sm:$0xff] %vm49_vm0, %v890_v11  ;;  %v578_v28 = vsub.f32 %v890_v11, %v1165_v30  ;;  %v498_v12 = vpop.f32.mrb[5].mxu1  ;;  %v610_v15 = vsel %vm49_vm0, %v592_v8, 0.0 }
 0x28d   :  { %v608_v13 = vsel %vm49_vm0, %v591_v10, 0.0  ;;  %561 = vst.msk [vmem:[%s1353_s3 + $0x20] sm:$0xff] %vm49_vm0, %v498_v12  ;;  %v577_v27 = vsub.f32 %v498_v12, %v1156_v29 }
 0x28e   :  { %v609_v14 = vadd.f32 %v608_v13, %v607_v7  ;;  %v594_v16 = vmul.f32 %v578_v28, %v578_v28 }
 0x28f   :  { %v593_v17 = vmul.f32 %v577_v27, %v577_v27  ;;  %v893_v18 = vpop.f32.mrb[6].mxu1 }
 0x290   :  { %v611_v19 = vadd.f32 %v610_v15, %v609_v14  ;;  %564 = vst.msk [vmem:[%s1353_s3 + $0x38] sm:$0xff] %vm49_vm0, %v893_v18  ;;  %v580_v30 = vsub.f32 %v893_v18, %v1179_v32  ;;  %v508_v20 = vpop.f32.mrb[7].mxu1  ;;  %v614_v23 = vsel %vm49_vm0, %v594_v16, 0.0 }
 0x291   :  { %v612_v21 = vsel %vm49_vm0, %v593_v17, 0.0  ;;  %563 = vst.msk [vmem:[%s1353_s3 + $0x30] sm:$0xff] %vm49_vm0, %v508_v20  ;;  %v579_v29 = vsub.f32 %v508_v20, %v1170_v31 }
 0x292   :  { %v613_v22 = vadd.f32 %v612_v21, %v611_v19  ;;  %v596_v24 = vmul.f32 %v580_v30, %v580_v30 }
 0x293   :  { %v595_v25 = vmul.f32 %v579_v29, %v579_v29  ;;  %v896_v41 = vpop.f32.mrb[8].mxu1 }
 0x294   :  { %v615_v42 = vadd.f32 %v614_v23, %v613_v22  ;;  %566 = vst.msk [vmem:[%s1353_s3 + $0x48] sm:$0xff] %vm49_vm0, %v896_v41  ;;  %v582_v32 = vsub.f32 %v896_v41, %v1193_v34  ;;  %v518_v44 = vpop.f32.mrb[9].mxu1  ;;  %v618_v47 = vsel %vm49_vm0, %v596_v24, 0.0 }
 0x295   :  { %v616_v45 = vsel %vm49_vm0, %v595_v25, 0.0  ;;  %565 = vst.msk [vmem:[%s1353_s3 + $0x40] sm:$0xff] %vm49_vm0, %v518_v44  ;;  %v581_v31 = vsub.f32 %v518_v44, %v1184_v33 }
 0x296   :  { %v617_v46 = vadd.f32 %v616_v45, %v615_v42  ;;  %v598_v48 = vmul.f32 %v582_v32, %v582_v32 }
 0x297   :  { %v597_v49 = vmul.f32 %v581_v31, %v581_v31  ;;  %v899_v50 = vpop.f32.mrb[10].mxu1 }
 0x298   :  { %v619_v43 = vadd.f32 %v618_v47, %v617_v46  ;;  %568 = vst.msk [vmem:[%s1353_s3 + $0x58] sm:$0xff] %vm49_vm0, %v899_v50  ;;  %v584_v34 = vsub.f32 %v899_v50, %v1207_v36  ;;  %v528_v51 = vpop.f32.mrb[11].mxu1  ;;  %v622_v54 = vsel %vm49_vm0, %v598_v48, 0.0 }
 0x299   :  { %v620_v52 = vsel %vm49_vm0, %v597_v49, 0.0  ;;  %567 = vst.msk [vmem:[%s1353_s3 + $0x50] sm:$0xff] %vm49_vm0, %v528_v51  ;;  %v583_v33 = vsub.f32 %v528_v51, %v1198_v35 }
 0x29a   :  { %v621_v53 = vadd.f32 %v620_v52, %v619_v43  ;;  %v600_v55 = vmul.f32 %v584_v34, %v584_v34 }
 0x29b   :  { %v599_v56 = vmul.f32 %v583_v33, %v583_v33  ;;  %v902_v57 = vpop.f32.mrb[12].mxu1 }
 0x29c   :  { %v623_v58 = vadd.f32 %v622_v54, %v621_v53  ;;  %570 = vst.msk [vmem:[%s1353_s3 + $0x68] sm:$0xff] %vm49_vm0, %v902_v57  ;;  %v586_v36 = vsub.f32 %v902_v57, %v1221_v38  ;;  %v538_v59 = vpop.f32.mrb[13].mxu1  ;;  %v626_v62 = vsel %vm49_vm0, %v600_v55, 0.0 }
 0x29d   :  { %v624_v60 = vsel %vm49_vm0, %v599_v56, 0.0  ;;  %569 = vst.msk [vmem:[%s1353_s3 + $0x60] sm:$0xff] %vm49_vm0, %v538_v59  ;;  %v585_v35 = vsub.f32 %v538_v59, %v1212_v37 }
 0x29e   :  { %v625_v61 = vadd.f32 %v624_v60, %v623_v58  ;;  %v602_v63 = vmul.f32 %v586_v36, %v586_v36 }
 0x29f   :  { %v601_v0 = vmul.f32 %v585_v35, %v585_v35  ;;  %v905_v1 = vpop.f32.mrb[14].mxu1 }
 0x2a0   :  { %v627_v2 = vadd.f32 %v626_v62, %v625_v61  ;;  %572 = vst.msk [vmem:[%s1353_s3 + $0x78] sm:$0xff] %vm49_vm0, %v905_v1  ;;  %v588_v38 = vsub.f32 %v905_v1, %v1235_v40  ;;  %v548_v3 = vpop.f32.mrb[15].mxu1  ;;  %v630_v5 = vsel %vm49_vm0, %v602_v63, 0.0 }
 0x2a1   :  { %v628_v4 = vsel %vm49_vm0, %v601_v0, 0.0  ;;  %571 = vst.msk [vmem:[%s1353_s3 + $0x70] sm:$0xff] %vm49_vm0, %v548_v3  ;;  %v587_v37 = vsub.f32 %v548_v3, %v1226_v39  ;;  %s1015_s3 = smov [#allocation2]  }
 0x2a2   :  { %v629_v26 = vadd.f32 %v628_v4, %v627_v2  ;;  %v604_v6 = vmul.f32 %v588_v38, %v588_v38  ;;  %s655_s28 = sshll.u32 %s1015_s3, 4  ;;  %s656_s28 = int_to_ptr.vmem [resolvable:$true] %s655_s28 }
 0x2a3   :  { %v603_v9 = vmul.f32 %v587_v37, %v587_v37  ;;  %s990_s30 = scalar_lea.vmem %s656_s28, 128  ;;  %p995_p1 = scmp.lt.s32.totalorder %s656_s28, %s656_s28 }
 0x2a4   :  { %v631_v7 = vadd.f32 %v630_v5, %v629_v26  ;;  %v634_v40 = vsel %vm49_vm0, %v604_v6, 0.0  ;;  %p991_p0 = scmp.ne.s32.totalorder %s656_s28, %s990_s30  ;;  %p996_p2 = scmp.lt.s32.totalorder %s990_s30, %s990_s30 }
 0x2a5   :  { %v632_v8 = vsel %vm49_vm0, %v603_v9, 0.0 }
 0x2a6   :  { %v633_v10 = vadd.f32 %v632_v8, %v631_v7  ;;  %p997_p3 = por %p996_p2, %p995_p1 }
 0x2a8   :  { %v635_v11 = vadd.f32 %v634_v40, %v633_v10  ;;  %p998_p4 = pnand %p997_p3, %p991_p0 }
 0x2aa   :  { %636 = vadd.xlane.f32.xlu0 %v635_v11 }
 0x337   :  { %v637_v28 = vpop.xlane.xlu0 %636 }
 0x338   :  { %v638_v12 = vrot.slane %v637_v28, 4 }
 0x33a   :  { %v639_v13 = vadd.f32 %v638_v12, %v637_v28 }
 0x33c   :  { %v640_v27 = vrot.slane %v639_v13, 2 }
 0x33e   :  { %v641_v14 = vadd.f32 %v640_v27, %v639_v13 }
 0x340   :  { %v642_v15 = vrot.slane %v641_v14, 1 }
 0x342   :  { %v643_v39 = vadd.f32 %v642_v15, %v641_v14 }
 0x344   :  { %986 = vpush %v643_v39 }
 0x375   :  { %s987_s29 = spop %986 }
 0x376   :  { %v645_v16 = vstv %s987_s29 }
 0x377   :  { %646 = vst [vmem:[#allocation2] sm:$0xff] %v645_v16 }
 0x378   :  { %1001 = shalt.err (!%p998_p4)
}
 0x379   :  { %s1002_s7 = scalar_lea.hbm %s1354_s4, 128 }
 0x37a   :  { %p1003_p5 = scmp.ne.s32.totalorder %s1354_s4, %s1002_s7  ;;  %p1006_p6 = scmp.lt.u32.totalorder %s1002_s7, %s1354_s4 }
 0x37c   :  { %p1008_p7 = pnand %p1006_p6, %p1003_p5 }
 0x37e   :  { %1011 = shalt.err (!%p1008_p7)
}
 0x37f   :  { %658 = dma.vmem_to_hbm [thread:$0]  %s656_s28, 128, %s1354_s4, [#allocation3]  }
 0x380   :  { %1012 = dma.done.wait [#allocation3], 128  }
 0x381   :  { %1013 = vsyncadd [#allocation3], 4294967168 }
 0x382   :  { %664 = vsyncpa [#allocation3], 1 }

</bundles_post_ra>
